<compile_context>
chip_gen: v7x
topology: tpu7x:2x2x1
jax: 0.10.0
libtpu: 0.0.40
codegen_flags: <defaults>
</compile_context>

<pallas_src>
import jax
import jax.numpy as jnp
from jax.experimental import pallas as pl
from jax.experimental.pallas import tpu as pltpu

B, C_IN, H, W = 2, 4, 16, 16          # small NCHW input, as in the PyTorch module
KH = KW = 3
HW = H * W                             # 256
K_DIM = KH * KW * C_IN                 # 36
C_FEAT = 32                            # backbone feature dim
LAYER_SET = (2 * C_FEAT, 48, 32)       # cfg.Tailnet.layer_set (layer_number = 2)
NPATCH = 2 * B * HW                    # 1024 (x and x_mask streams fused)

# ---- parameter-slab layout: one [SLAB_ROWS, 128] f32 array, 8-aligned rows --
ROW_CW = 0                             # cw^T       [C_FEAT, K_DIM] = [32, 36]
ROW_CB = ROW_CW + C_FEAT               # cb column  [32, 1]
ROW_W1 = ROW_CB + C_FEAT               # w1^T       [48, 64]
ROW_B1 = ROW_W1 + LAYER_SET[1]         # b1 column  [48, 1]
ROW_W2 = ROW_B1 + LAYER_SET[1]         # w2^T       [32, 48]
ROW_B2 = ROW_W2 + LAYER_SET[2]         # b2 column  [32, 1]
ROW_W3 = ROW_B2 + LAYER_SET[2]         # w3^T       [1, 32]
ROW_B3 = ROW_W3 + 8                    # b3         [1, 1]
SLAB_ROWS = ROW_B3 + 8                 # 240
SLAB_COLS = 128


# ----------------------------- Pallas kernel --------------------------------
def fwd_kernel(p_ref, prm_ref, out_ref):
    f32 = jnp.float32

    def prm(row, nrows, ncols):
        return prm_ref[pl.ds(row, nrows), pl.ds(0, ncols)]

    cw_t = prm(ROW_CW, C_FEAT, K_DIM)                 # [32, 36]
    cb_c = prm(ROW_CB, C_FEAT, 1)                     # [32, 1]
    w1_t = prm(ROW_W1, LAYER_SET[1], LAYER_SET[0])    # [48, 64]
    b1_c = prm(ROW_B1, LAYER_SET[1], 1)               # [48, 1]
    w2_t = prm(ROW_W2, LAYER_SET[2], LAYER_SET[1])    # [32, 48]
    b2_c = prm(ROW_B2, LAYER_SET[2], 1)               # [32, 1]
    w3_t = prm(ROW_W3, 1, LAYER_SET[2])               # [1, 32]
    b3_c = prm(ROW_B3, 1, 1)                          # [1, 1]

    # Backbone conv for BOTH streams in one lane-dense MXU pass:
    # [32, 36] @ [36, 2*B*H*W] -> [32, 1024]; bias + ReLU on full vregs (VPU).
    a = jnp.dot(cw_t, p_ref[...], preferred_element_type=f32) + cb_c
    a = jnp.maximum(a, 0.0)

    # Global average pool per (stream, batch) group of HW lanes: XLU lane
    # reductions over vreg-aligned (multiple-of-128 offset) slices.
    sums = [jnp.sum(a[:, g * HW:(g + 1) * HW], axis=1, keepdims=True)
            for g in range(2 * B)]                    # each [32, 1]
    inv_hw = f32(1.0 / HW)
    fx_t = jnp.concatenate(sums[:B], axis=1) * inv_hw   # [32, B]  (x stream)
    fm_t = jnp.concatenate(sums[B:], axis=1) * inv_hw   # [32, B]  (x_mask)

    # torch.cat([fx, fm], -1) in the transposed orientation = row-stack.
    cat_t = jnp.concatenate([fx_t, fm_t], axis=0)        # [64, B]

    # Tailnet (Linear, Dropout, Linear, Dropout) + f2; Dropout is identity at
    # inference.  self.sigmoid is defined in __init__ but NOT applied in forward().
    # TODO(synk): training-mode dropout (cfg.TRAIN.full_dropout) not implemented.
    h = jnp.dot(w1_t, cat_t, preferred_element_type=f32) + b1_c   # [48, B]
    h = jnp.dot(w2_t, h, preferred_element_type=f32) + b2_c       # [32, B]
    out_ref[...] = jnp.dot(w3_t, h, preferred_element_type=f32) + b3_c  # [1, B]


# ------------------------------- JAX glue ------------------------------------
def im2col_3x3_pad1(x_nchw):
    """NCHW -> [B*H*W, KH*KW*C] patches with (kh, kw, c) ordering (c fastest)."""
    b, c, h, w = x_nchw.shape
    x_nhwc = jnp.transpose(x_nchw, (0, 2, 3, 1))
    xp = jnp.pad(x_nhwc, ((0, 0), (1, 1), (1, 1), (0, 0)))
    cols = [xp[:, i:i + h, j:j + w, :] for i in range(KH) for j in range(KW)]
    return jnp.concatenate(cols, axis=-1).reshape(b * h * w, KH * KW * c)


@jax.jit
def model_builder_forward(x, x_mask, param_slab, x_brisque=None):
    del x_brisque  # present in the PyTorch signature but unused
    # Fuse both streams into one lane-dense patch operand [36, 2*B*H*W].
    # Under jit all of this glue fuses on-device (no eager dispatch per call).
    patches_t = jnp.concatenate(
        [im2col_3x3_pad1(x), im2col_3x3_pad1(x_mask)], axis=0).T   # [36, 1024]

    out_t = pl.pallas_call(
        fwd_kernel,
        out_shape=jax.ShapeDtypeStruct((1, B), jnp.float32),
        grid_spec=pltpu.PrefetchScalarGridSpec(
            num_scalar_prefetch=0,
            grid=(1,),
            in_specs=[pl.BlockSpec((K_DIM, NPATCH), lambda i: (0, 0)),
                      pl.BlockSpec((SLAB_ROWS, SLAB_COLS), lambda i: (0, 0))],
            out_specs=pl.BlockSpec((1, B), lambda i: (0, 0)),
        ),
        compiler_params=pltpu.CompilerParams(
            dimension_semantics=("arbitrary",)),
    )(patches_t, param_slab)
    return out_t.T                                                  # [B, 1]


# --------------------------- deterministic params ----------------------------
def init_params(key):
    ks = jax.random.split(key, 8)

    def lin(k, fan_in, fan_out):
        return (jax.random.normal(k, (fan_in, fan_out), jnp.float32)
                / jnp.sqrt(jnp.float32(fan_in)))

    return dict(
        cw=lin(ks[0], K_DIM, C_FEAT),
        cb=0.01 * jax.random.normal(ks[1], (1, C_FEAT), jnp.float32),
        w1=lin(ks[2], LAYER_SET[0], LAYER_SET[1]),
        b1=0.01 * jax.random.normal(ks[3], (1, LAYER_SET[1]), jnp.float32),
        w2=lin(ks[4], LAYER_SET[1], LAYER_SET[2]),
        b2=0.01 * jax.random.normal(ks[5], (1, LAYER_SET[2]), jnp.float32),
        w3=lin(ks[6], LAYER_SET[2], 1),
        b3=0.01 * jax.random.normal(ks[7], (1, 1), jnp.float32),
    )


def pack_params(p):
    """Pack all (transposed) weights/biases into one [SLAB_ROWS, 128] f32 slab."""
    slab = jnp.zeros((SLAB_ROWS, SLAB_COLS), jnp.float32)

    def put(s, row, arr):
        return s.at[row:row + arr.shape[0], :arr.shape[1]].set(arr)

    slab = put(slab, ROW_CW, p['cw'].T)   # [32, 36]
    slab = put(slab, ROW_CB, p['cb'].T)   # [32, 1]
    slab = put(slab, ROW_W1, p['w1'].T)   # [48, 64]
    slab = put(slab, ROW_B1, p['b1'].T)   # [48, 1]
    slab = put(slab, ROW_W2, p['w2'].T)   # [32, 48]
    slab = put(slab, ROW_B2, p['b2'].T)   # [32, 1]
    slab = put(slab, ROW_W3, p['w3'].T)   # [1, 32]
    slab = put(slab, ROW_B3, p['b3'].T)   # [1, 1]
    return slab


# ------------------------------ pure-JAX reference ---------------------------
def reference_forward(x, x_mask, params):
    def backbone(inp):
        p = im2col_3x3_pad1(inp).reshape(B, HW, K_DIM)
        a = jnp.maximum(jnp.einsum('bpk,kc->bpc', p, params['cw']) + params['cb'], 0.0)
        return jnp.mean(a, axis=1)

    fx, fm = backbone(x), backbone(x_mask)
    h = jnp.concatenate([fx, fm], axis=-1) @ params['w1'] + params['b1']
    h = h @ params['w2'] + params['b2']
    return h @ params['w3'] + params['b3']


if __name__ == "__main__":
    key = jax.random.PRNGKey(0)
    kx, km, kp = jax.random.split(key, 3)
    x = jax.random.normal(kx, (B, C_IN, H, W), jnp.float32)
    x_mask = jax.random.normal(km, (B, C_IN, H, W), jnp.float32)
    params = init_params(kp)
    param_slab = pack_params(params)

    out = model_builder_forward(x, x_mask, param_slab)
    out = jax.block_until_ready(out)

    ref = reference_forward(x, x_mask, params)
    assert out.shape == (B, 1), out.shape
    assert jnp.allclose(out, ref, rtol=1e-4, atol=1e-4), (out, ref)
    print("KERNEL_OK")
</pallas_src>

<mosaic_0001>
module attributes {stable_mosaic.version = 11 : i64} {
  func.func @fwd_kernel(%arg0: i32, %arg1: memref<36x1024xf32, #tpu.memory_space<vmem>>, %arg2: memref<240x128xf32, #tpu.memory_space<vmem>>, %arg3: memref<1x2xf32, #tpu.memory_space<vmem>>) attributes {dimension_semantics = [#tpu.dimension_semantics<arbitrary>], iteration_bounds = array<i64: 1>, scalar_prefetch = 0 : i64, scratch_operands = 0 : i64, tpu.core_type = #tpu.core_type<tc>, window_params = [{pipeline_mode = #tpu.pipeline_mode<synchronous>, transform_indices = @transform_0, window_bounds = array<i64: 36, 1024>}, {pipeline_mode = #tpu.pipeline_mode<synchronous>, transform_indices = @transform_1, window_bounds = array<i64: 240, 128>}, {pipeline_mode = #tpu.pipeline_mode<synchronous>, transform_indices = @transform_2, window_bounds = array<i64: 1, 2>}]} {
    %c0 = arith.constant 0 : index
    %c0_0 = arith.constant 0 : index
    %0 = vector.load %arg2[%c0, %c0_0] : memref<240x128xf32, #tpu.memory_space<vmem>>, vector<32x36xf32>
    %c32 = arith.constant 32 : index
    %c0_1 = arith.constant 0 : index
    %1 = vector.load %arg2[%c32, %c0_1] : memref<240x128xf32, #tpu.memory_space<vmem>>, vector<32x1xf32>
    %c64 = arith.constant 64 : index
    %c0_2 = arith.constant 0 : index
    %2 = vector.load %arg2[%c64, %c0_2] : memref<240x128xf32, #tpu.memory_space<vmem>>, vector<48x64xf32>
    %c112 = arith.constant 112 : index
    %c0_3 = arith.constant 0 : index
    %3 = vector.load %arg2[%c112, %c0_3] : memref<240x128xf32, #tpu.memory_space<vmem>>, vector<48x1xf32>
    %c160 = arith.constant 160 : index
    %c0_4 = arith.constant 0 : index
    %4 = vector.load %arg2[%c160, %c0_4] : memref<240x128xf32, #tpu.memory_space<vmem>>, vector<32x48xf32>
    %c192 = arith.constant 192 : index
    %c0_5 = arith.constant 0 : index
    %5 = vector.load %arg2[%c192, %c0_5] : memref<240x128xf32, #tpu.memory_space<vmem>>, vector<32x1xf32>
    %c224 = arith.constant 224 : index
    %c0_6 = arith.constant 0 : index
    %6 = vector.load %arg2[%c224, %c0_6] : memref<240x128xf32, #tpu.memory_space<vmem>>, vector<1x32xf32>
    %c232 = arith.constant 232 : index
    %c0_7 = arith.constant 0 : index
    %7 = vector.load %arg2[%c232, %c0_7] : memref<240x128xf32, #tpu.memory_space<vmem>>, vector<1x1xf32>
    %c0_8 = arith.constant 0 : index
    %c0_9 = arith.constant 0 : index
    %8 = vector.load %arg1[%c0_8, %c0_9] : memref<36x1024xf32, #tpu.memory_space<vmem>>, vector<36x1024xf32>
    %cst = arith.constant dense<0.000000e+00> : vector<32x1024xf32>
    %9 = tpu.matmul %0, %8, %cst {dimension_numbers = #tpu.dot_dimension_numbers<[1], [0], [0], [1], [0, 0, 1, 1], [], []>} : vector<32x36xf32>, vector<36x1024xf32>, vector<32x1024xf32> -> vector<32x1024xf32>
    %10 = vector.broadcast %1 : vector<32x1xf32> to vector<32x1024xf32>
    %11 = arith.addf %9, %10 : vector<32x1024xf32>
    %cst_10 = arith.constant 0.000000e+00 : f32
    %12 = vector.broadcast %cst_10 : f32 to vector<32x1024xf32>
    %13 = arith.maximumf %11, %12 : vector<32x1024xf32>
    %14 = vector.extract_strided_slice %13 {offsets = [0, 0], sizes = [32, 256], strides = [1, 1]} : vector<32x1024xf32> to vector<32x256xf32>
    %cst_11 = arith.constant dense<0.000000e+00> : vector<32xf32>
    %15 = vector.multi_reduction <add>, %14, %cst_11 [1] : vector<32x256xf32> to vector<32xf32>
    %16 = vector.shape_cast %15 : vector<32xf32> to vector<32x1xf32>
    %17 = vector.extract_strided_slice %13 {offsets = [0, 256], sizes = [32, 256], strides = [1, 1]} : vector<32x1024xf32> to vector<32x256xf32>
    %cst_12 = arith.constant dense<0.000000e+00> : vector<32xf32>
    %18 = vector.multi_reduction <add>, %17, %cst_12 [1] : vector<32x256xf32> to vector<32xf32>
    %19 = vector.shape_cast %18 : vector<32xf32> to vector<32x1xf32>
    %20 = vector.extract_strided_slice %13 {offsets = [0, 512], sizes = [32, 256], strides = [1, 1]} : vector<32x1024xf32> to vector<32x256xf32>
    %cst_13 = arith.constant dense<0.000000e+00> : vector<32xf32>
    %21 = vector.multi_reduction <add>, %20, %cst_13 [1] : vector<32x256xf32> to vector<32xf32>
    %22 = vector.shape_cast %21 : vector<32xf32> to vector<32x1xf32>
    %23 = vector.extract_strided_slice %13 {offsets = [0, 768], sizes = [32, 256], strides = [1, 1]} : vector<32x1024xf32> to vector<32x256xf32>
    %cst_14 = arith.constant dense<0.000000e+00> : vector<32xf32>
    %24 = vector.multi_reduction <add>, %23, %cst_14 [1] : vector<32x256xf32> to vector<32xf32>
    %25 = vector.shape_cast %24 : vector<32xf32> to vector<32x1xf32>
    %26 = tpu.concatenate %16, %19 in 1 : vector<32x1xf32>, vector<32x1xf32> -> vector<32x2xf32>
    %cst_15 = arith.constant 3.906250e-03 : f32
    %27 = vector.broadcast %cst_15 : f32 to vector<32x2xf32>
    %28 = arith.mulf %26, %27 : vector<32x2xf32>
    %29 = tpu.concatenate %22, %25 in 1 : vector<32x1xf32>, vector<32x1xf32> -> vector<32x2xf32>
    %cst_16 = arith.constant 3.906250e-03 : f32
    %30 = vector.broadcast %cst_16 : f32 to vector<32x2xf32>
    %31 = arith.mulf %29, %30 : vector<32x2xf32>
    %32 = tpu.concatenate %28, %31 in 0 : vector<32x2xf32>, vector<32x2xf32> -> vector<64x2xf32>
    %cst_17 = arith.constant dense<0.000000e+00> : vector<48x2xf32>
    %33 = tpu.matmul %2, %32, %cst_17 {dimension_numbers = #tpu.dot_dimension_numbers<[1], [0], [0], [1], [0, 0, 1, 1], [], []>} : vector<48x64xf32>, vector<64x2xf32>, vector<48x2xf32> -> vector<48x2xf32>
    %34 = vector.broadcast %3 : vector<48x1xf32> to vector<48x2xf32>
    %35 = arith.addf %33, %34 : vector<48x2xf32>
    %cst_18 = arith.constant dense<0.000000e+00> : vector<32x2xf32>
    %36 = tpu.matmul %4, %35, %cst_18 {dimension_numbers = #tpu.dot_dimension_numbers<[1], [0], [0], [1], [0, 0, 1, 1], [], []>} : vector<32x48xf32>, vector<48x2xf32>, vector<32x2xf32> -> vector<32x2xf32>
    %37 = vector.broadcast %5 : vector<32x1xf32> to vector<32x2xf32>
    %38 = arith.addf %36, %37 : vector<32x2xf32>
    %cst_19 = arith.constant dense<0.000000e+00> : vector<1x2xf32>
    %39 = tpu.matmul %6, %38, %cst_19 {dimension_numbers = #tpu.dot_dimension_numbers<[1], [0], [0], [1], [0, 0, 1, 1], [], []>} : vector<1x32xf32>, vector<32x2xf32>, vector<1x2xf32> -> vector<1x2xf32>
    %40 = vector.broadcast %7 : vector<1x1xf32> to vector<1x2xf32>
    %41 = arith.addf %39, %40 : vector<1x2xf32>
    %c0_20 = arith.constant 0 : index
    %c0_21 = arith.constant 0 : index
    %42 = vector.load %arg3[%c0_20, %c0_21] : memref<1x2xf32, #tpu.memory_space<vmem>>, vector<1x2xf32>
    tpu.vector_store %arg3[%c0_20, %c0_21], %41 {strides = array<i32>} : memref<1x2xf32, #tpu.memory_space<vmem>>, vector<1x2xf32>,
    return
  }
  func.func @transform_0(%arg0: i32) -> (i32, i32) {
    %c0_i32 = arith.constant 0 : i32
    %c0_i32_0 = arith.constant 0 : i32
    %c0_i32_1 = arith.constant 0 : i32
    return %c0_i32, %c0_i32_0 : i32, i32
  }
  func.func @transform_1(%arg0: i32) -> (i32, i32) {
    %c0_i32 = arith.constant 0 : i32
    %c0_i32_0 = arith.constant 0 : i32
    %c0_i32_1 = arith.constant 0 : i32
    return %c0_i32, %c0_i32_0 : i32, i32
  }
  func.func @transform_2(%arg0: i32) -> (i32, i32) {
    %c0_i32 = arith.constant 0 : i32
    %c0_i32_0 = arith.constant 0 : i32
    %c0_i32_1 = arith.constant 0 : i32
    return %c0_i32, %c0_i32_0 : i32, i32
  }
}

</mosaic_0001>

<bundles_post_ra>
// kernel: model_builder_forward.1
= control target key start
LH: loop header
LB: loop body
LE: loop exit
PB: predicated region body
PF: predicated region fallthrough
CT: control target
= control target key end

     0   :  { %v1165_v7 = vmov 0.0   ;;  %v1166_v13 = vmov 0   ;;  %vm115_vm0 = vcmask 1043456   ;;  %vm102_vm1 = vcmask 293888   ;;  %s1512_s0 = inlined_call_operand.vmem [shape: f32[36,1024], index: 0, kind: input, shape index: {}]   ;;  %s1513_s1 = inlined_call_operand.vmem [shape: f32[240,128], index: 1, kind: input, shape index: {}]   ;;  %s1514_s2 = inlined_call_operand.hbm [shape: f32[1,2], index: 2, kind: output, shape index: {}]  }
   0x1   :  { %v43_v0 = vld [vmem:[%s1512_s0 + $0x8] sm:$0xff]  ;;  %v45_v2 = vld [vmem:[%s1512_s0 + $0x18] sm:$0xff]  ;;  %v42_v5 = vld [vmem:[%s1512_s0] sm:$0xff]  ;;  %204 = vmatprep.mubr.f32.mxu0 %v1165_v7  ;;  %293 = vmatprep.mubr.f32.mxu1 %v1165_v7 }
   0x2   :  { %v51_v1 = vld [vmem:[%s1512_s0 + $0x48] sm:$0xff]  ;;  %v53_v4 = vld [vmem:[%s1512_s0 + $0x58] sm:$0xff]  ;;  %v50_v6 = vld [vmem:[%s1512_s0 + $0x40] sm:$0xff]  ;;  %1139 = vset.pattern.permute.xlu0 %v1166_v13  ;;  %1140 = vset.pattern.permute.xlu1 %v1166_v13 }
   0x3   :  { %v1068_v3 = vpack.c.bf16 %v51_v1, %v43_v0  ;;  %v1076_v8 = vpack.c.bf16 %v53_v4, %v45_v2  ;;  %v1070_v9 = vpack.c.bf16 %v50_v6, %v42_v5  ;;  %v44_v10 = vld [vmem:[%s1512_s0 + $0x10] sm:$0xff]  ;;  %v59_v12 = vld [vmem:[%s1512_s0 + $0x88] sm:$0xff]  ;;  %v61_v16 = vld [vmem:[%s1512_s0 + $0x98] sm:$0xff] }
   0x4   :  { %v52_v11 = vld [vmem:[%s1512_s0 + $0x50] sm:$0xff]  ;;  %v67_v15 = vld [vmem:[%s1512_s0 + $0xc8] sm:$0xff]  ;;  %v69_v17 = vld [vmem:[%s1512_s0 + $0xd8] sm:$0xff] }
   0x5   :  { %1069 = vmatprep.subr.bf16.mxu0 %v1068_v3  ;;  %v1078_v14 = vpack.c.bf16 %v52_v11, %v44_v10  ;;  %1077 = vmatprep.subr.bf16.mxu1 %v1076_v8  ;;  %v1072_v18 = vpack.c.bf16 %v67_v15, %v59_v12  ;;  %v1080_v19 = vpack.c.bf16 %v69_v17, %v61_v16  ;;  %v58_v20 = vld [vmem:[%s1512_s0 + $0x80] sm:$0xff]  ;;  %v60_v22 = vld [vmem:[%s1512_s0 + $0x90] sm:$0xff]  ;;  %v75_v26 = vld [vmem:[%s1512_s0 + $0x108] sm:$0xf] }
   0x6   :  { %1071 = vmatpush1.bf16.msra.mxu0 %v1070_v9  ;;  %v66_v21 = vld [vmem:[%s1512_s0 + $0xc0] sm:$0xff]  ;;  %v68_v24 = vld [vmem:[%s1512_s0 + $0xd0] sm:$0xff]  ;;  %v77_v27 = vld [vmem:[%s1512_s0 + $0x118] sm:$0xf] }
   0x7   :  { %1079 = vmatpush1.bf16.msra.mxu1 %v1078_v14  ;;  %v1074_v23 = vpack.c.bf16 %v66_v21, %v58_v20  ;;  %1073 = vmatprep.subr.bf16.mxu0 %v1072_v18  ;;  %v1082_v25 = vpack.c.bf16 %v68_v24, %v60_v22  ;;  %v74_v28 = vld [vmem:[%s1512_s0 + $0x100] sm:$0xf]  ;;  %v76_v29 = vld [vmem:[%s1512_s0 + $0x110] sm:$0xf]  ;;  %v47_v30 = vld [vmem:[%s1512_s0 + $0x28] sm:$0xff] }
   0x8   :  { %1081 = vmatprep.subr.bf16.mxu1 %v1080_v19  ;;  %v55_v31 = vld [vmem:[%s1512_s0 + $0x68] sm:$0xff]  ;;  %v46_v32 = vld [vmem:[%s1512_s0 + $0x20] sm:$0xff]  ;;  %v49_v34 = vld [vmem:[%s1512_s0 + $0x38] sm:$0xff] }
   0x9   :  { %v54_v33 = vld [vmem:[%s1512_s0 + $0x60] sm:$0xff]  ;;  %v57_v35 = vld [vmem:[%s1512_s0 + $0x78] sm:$0xff]  ;;  %v48_v37 = vld [vmem:[%s1512_s0 + $0x30] sm:$0xff]  ;;  %v1084_v39 = vpack.c.bf16 %v55_v31, %v47_v30 }
   0xa   :  { %1075 = vmatpush1.bf16.msra.mxu0 %v1074_v23  ;;  %v1270_v36 = vld [vmem:[%s1513_s1] sm:$0xff]  ;;  %v56_v38 = vld [vmem:[%s1512_s0 + $0x70] sm:$0xff]  ;;  %v1086_v40 = vpack.c.bf16 %v54_v33, %v46_v32  ;;  %v1092_v41 = vpack.c.bf16 %v57_v35, %v49_v34  ;;  %v63_v42 = vld [vmem:[%s1512_s0 + $0xa8] sm:$0xff] }
   0xb   :  { %1083 = vmatpush1.bf16.msra.mxu1 %v1082_v25  ;;  %950 = vmatprep.subr.msk.mxu0 %vm115_vm0, %v75_v26  ;;  %v71_v43 = vld [vmem:[%s1512_s0 + $0xe8] sm:$0xff]  ;;  %v65_v44 = vld [vmem:[%s1512_s0 + $0xb8] sm:$0xff]  ;;  %v1094_v45 = vpack.c.bf16 %v56_v38, %v48_v37  ;;  %v62_v47 = vld [vmem:[%s1512_s0 + $0xa0] sm:$0xff] }
   0xc   :  { %956 = vmatprep.subr.msk.mxu1 %vm115_vm0, %v77_v27  ;;  %v73_v46 = vld [vmem:[%s1512_s0 + $0xf8] sm:$0xff]  ;;  %v70_v48 = vld [vmem:[%s1512_s0 + $0xe0] sm:$0xff]  ;;  %v13_v49 = vld [vmem:[%s1513_s1 + $0x8] sm:$0xff]  ;;  %v1088_v52 = vpack.c.bf16 %v71_v43, %v63_v42 }
   0xd   :  { %v64_v50 = vld [vmem:[%s1512_s0 + $0xb0] sm:$0xff]  ;;  %v1096_v53 = vpack.c.bf16 %v73_v46, %v65_v44  ;;  %v1090_v54 = vpack.c.bf16 %v70_v48, %v62_v47 }
   0xe   :  { %951 = vmatpush1.msk.msra.mxu0 %vm115_vm0, %v74_v28  ;;  %v72_v51 = vld [vmem:[%s1512_s0 + $0xf0] sm:$0xff] }
   0xf   :  { %957 = vmatpush1.msk.msra.mxu1 %vm115_vm0, %v76_v29  ;;  %952 = vmatmul.mubr.msk.f32.vlgmr.msra.gmra.mrb[0].mxu0 %vm102_vm1, %v1270_v36 }
  0x10   :  { %958 = vmatmul.mubr.msk.f32.vlgmr.msra.gmra.mrb[0].mxu1 %vm102_vm1, %v1270_v36  ;;  %210 = vmatprep.mubr.f32.mxu0 %v1165_v7 }
  0x11   :  { %299 = vmatprep.mubr.f32.mxu1 %v1165_v7  ;;  %1085 = vmatprep.subr.bf16.mxu0 %v1084_v39 }
  0x12   :  { %1087 = vmatpush1.bf16.msra.mxu0 %v1086_v40  ;;  %1093 = vmatprep.subr.bf16.mxu1 %v1092_v41 }
  0x13   :  { %7 = vsyncpa [#allocation3], 0  ;;  %953 = vmatmul.mubr.msk.f32.gmra.mrb[2].mxu0 %vm102_vm1, %v13_v49  ;;  %1095 = vmatpush1.bf16.msra.mxu1 %v1094_v45  ;;  %v1098_v55 = vpack.c.bf16 %v72_v51, %v64_v50  ;;  %v14_v56 = vld [vmem:[%s1513_s1 + $0x10] sm:$0xff]  ;;  %v79_v57 = vld [vmem:[%s1512_s0 + $0x128] sm:$0xf]  ;;  %vm623_vm2 = vcmask 523264  }
  0x14   :  { %959 = vmatmul.mubr.msk.f32.gmra.mrb[2].mxu1 %vm102_vm1, %v13_v49  ;;  %216 = vmatprep.mubr.f32.mxu0 %v1165_v7  ;;  %v81_v58 = vld [vmem:[%s1512_s0 + $0x138] sm:$0xf]  ;;  %v78_v59 = vld [vmem:[%s1512_s0 + $0x120] sm:$0xf]  ;;  %v80_v61 = vld [vmem:[%s1512_s0 + $0x130] sm:$0xf] }
  0x15   :  { %305 = vmatprep.mubr.f32.mxu1 %v1165_v7  ;;  %1089 = vmatprep.subr.bf16.mxu0 %v1088_v52  ;;  %v15_v60 = vld [vmem:[%s1513_s1 + $0x18] sm:$0xff]  ;;  %v16_v62 = vld [vmem:[%s1513_s1 + $0x20] sm:$0xff]  ;;  %v18_v63 = vld [vmem:[%s1513_s1 + $0x30] sm:$0xff]  ;;  %vm576_vm3 = vcmask 7168   ;;  %vm757_vm4 = vcmask 392192   ;;  %vm1168_vm5 = vmmov 0  }
  0x16   :  { %1097 = vmatprep.subr.bf16.mxu1 %v1096_v53  ;;  %1091 = vmatpush1.bf16.msra.mxu0 %v1090_v54  ;;  %v17_v0 = vld [vmem:[%s1513_s1 + $0x28] sm:$0xff]  ;;  %v19_v1 = vld [vmem:[%s1513_s1 + $0x38] sm:$0xff]  ;;  %vm860_vm6 = vcmask 261120   ;;  %s1169_s7 = smov [#allocation2]   ;;  %vm934_vm7 = vcmask 8192  }
  0x17   :  { %954 = vmatmul.mubr.msk.f32.gmra.mrb[4].mxu0 %vm102_vm1, %v14_v56  ;;  %1099 = vmatpush1.bf16.msra.mxu1 %v1098_v55  ;;  %s942_s8 = sshll.u32 %s1169_s7, 4  ;;  %s943_s8 = int_to_ptr.vmem [resolvable:$true] %s942_s8 }
  0x18   :  { %960 = vmatmul.mubr.msk.f32.gmra.mrb[4].mxu1 %vm102_vm1, %v14_v56  ;;  %222 = vmatprep.mubr.f32.mxu0 %v1165_v7  ;;  %s1141_s9 = scalar_lea.vmem %s943_s8, 16  ;;  %s1145_s10 = scalar_lea.vmem %s943_s8, 32 }
  0x19   :  { %311 = vmatprep.mubr.f32.mxu1 %v1165_v7  ;;  %962 = vmatprep.subr.msk.mxu0 %vm115_vm0, %v79_v57  ;;  %p1142_p0 = scmp.ne.s32.totalorder %s943_s8, %s1141_s9  ;;  %p1146_p1 = scmp.lt.s32.totalorder %s943_s8, %s943_s8 }
  0x1a   :  { %968 = vmatprep.subr.msk.mxu1 %vm115_vm0, %v81_v58  ;;  %963 = vmatpush1.msk.msra.mxu0 %vm115_vm0, %v78_v59  ;;  %p1147_p2 = scmp.lt.s32.totalorder %s1145_s10, %s1141_s9 }
  0x1b   :  { %955 = vmatmul.mubr.msk.f32.gmra.mrb[6].mxu0 %vm102_vm1, %v15_v60  ;;  %969 = vmatpush1.msk.msra.mxu1 %vm115_vm0, %v80_v61 }
  0x1c   :  { %961 = vmatmul.mubr.msk.f32.gmra.mrb[6].mxu1 %vm102_vm1, %v15_v60  ;;  %382 = vmatprep.mubr.f32.mxu0 %v1165_v7  ;;  %p1148_p3 = por %p1147_p2, %p1146_p1 }
  0x1d   :  { %471 = vmatprep.mubr.f32.mxu1 %v1165_v7  ;;  %84 = vperm.xlu0 %1139, %v16_v62  }
  0x1e   :  { %94 = vperm.xlu1 %1140, %v18_v63   ;;  %p1149_p4 = pnand %p1148_p3, %p1142_p0 }
  0x1f   :  { %964 = vmatmul.mubr.msk.f32.vlgmr.msra.gmra.mrb[8].mxu0 %vm102_vm1, %v1270_v36 }
  0x20   :  { %970 = vmatmul.mubr.msk.f32.vlgmr.msra.gmra.mrb[8].mxu1 %vm102_vm1, %v1270_v36  ;;  %388 = vmatprep.mubr.f32.mxu0 %v1165_v7 }
  0x21   :  { %477 = vmatprep.mubr.f32.mxu1 %v1165_v7  ;;  %89 = vperm.xlu0 %1139, %v17_v0  }
  0x22   :  { %99 = vperm.xlu1 %1140, %v19_v1  }
  0x23   :  { %965 = vmatmul.mubr.msk.f32.gmra.mrb[10].mxu0 %vm102_vm1, %v13_v49 }
  0x24   :  { %971 = vmatmul.mubr.msk.f32.gmra.mrb[10].mxu1 %vm102_vm1, %v13_v49  ;;  %394 = vmatprep.mubr.f32.mxu0 %v1165_v7 }
  0x25   :  { %483 = vmatprep.mubr.f32.mxu1 %v1165_v7 }
  0x27   :  { %966 = vmatmul.mubr.msk.f32.gmra.mrb[12].mxu0 %vm102_vm1, %v14_v56 }
  0x28   :  { %972 = vmatmul.mubr.msk.f32.gmra.mrb[12].mxu1 %vm102_vm1, %v14_v56  ;;  %400 = vmatprep.mubr.f32.mxu0 %v1165_v7 }
  0x29   :  { %489 = vmatprep.mubr.f32.mxu1 %v1165_v7 }
  0x2b   :  { %967 = vmatmul.mubr.msk.f32.gmra.mrb[14].mxu0 %vm102_vm1, %v15_v60 }
  0x2c   :  { %973 = vmatmul.mubr.msk.f32.gmra.mrb[14].mxu1 %vm102_vm1, %v15_v60 }
  0x9c   :  { %v1375_v2 = vpop.permute.xlu0 %84 }
  0x9d   :  { %v1385_v22 = vpop.permute.xlu1 %94 }
  0xa0   :  { %v1381_v14 = vpop.permute.xlu0 %89 }
  0xa1   :  { %v1393_v44 = vpop.permute.xlu1 %99 }
  0xe2   :  { %v206_v3 = vpop.f32.mrb[0].mxu0 }
  0xe3   :  { %v207_v4 = vadd.f32 %v206_v3, %v1375_v2  ;;  %v295_v5 = vpop.f32.mrb[0].mxu1  ;;  %v208_v6 = vpop.f32.mrb[1].mxu0 }
  0xe4   :  { %v296_v8 = vadd.f32 %v295_v5, %v1375_v2  ;;  %v209_v9 = vadd.f32 %v208_v6, %v1375_v2  ;;  %v297_v10 = vpop.f32.mrb[1].mxu1 }
  0xe5   :  { %v496_v11 = vmax.f32 %v207_v4, 0.0  ;;  %v298_v12 = vadd.f32 %v297_v10, %v1375_v2 }
  0xe6   :  { %v498_v13 = vmax.f32 %v296_v8, 0.0  ;;  %v497_v15 = vmax.f32 %v209_v9, 0.0  ;;  %v212_v16 = vpop.f32.mrb[2].mxu0 }
  0xe7   :  { %v499_v17 = vmax.f32 %v298_v12, 0.0  ;;  %v213_v18 = vadd.f32 %v212_v16, %v1381_v14  ;;  %v301_v19 = vpop.f32.mrb[2].mxu1  ;;  %v214_v20 = vpop.f32.mrb[3].mxu0 }
  0xe8   :  { %v302_v21 = vadd.f32 %v301_v19, %v1381_v14  ;;  %v215_v23 = vadd.f32 %v214_v20, %v1381_v14  ;;  %v303_v24 = vpop.f32.mrb[3].mxu1  ;;  %v528_v25 = vadd.f32 %v497_v15, %v496_v11 }
  0xe9   :  { %v504_v26 = vmax.f32 %v213_v18, 0.0  ;;  %v304_v27 = vadd.f32 %v303_v24, %v1381_v14  ;;  %v540_v28 = vadd.f32 %v499_v17, %v498_v13 }
  0xea   :  { %v506_v29 = vmax.f32 %v302_v21, 0.0  ;;  %v505_v30 = vmax.f32 %v215_v23, 0.0  ;;  %v218_v31 = vpop.f32.mrb[4].mxu0  ;;  %529 = vadd.xlane.f32.xlu0 %v528_v25 }
  0xeb   :  { %v507_v32 = vmax.f32 %v304_v27, 0.0  ;;  %v219_v33 = vadd.f32 %v218_v31, %v1385_v22  ;;  %v307_v34 = vpop.f32.mrb[4].mxu1  ;;  %v220_v35 = vpop.f32.mrb[5].mxu0 }
  0xec   :  { %v308_v36 = vadd.f32 %v307_v34, %v1385_v22  ;;  %v221_v37 = vadd.f32 %v220_v35, %v1385_v22  ;;  %v309_v38 = vpop.f32.mrb[5].mxu1  ;;  %v531_v39 = vadd.f32 %v505_v30, %v504_v26 }
  0xed   :  { %v512_v40 = vmax.f32 %v219_v33, 0.0  ;;  %v310_v41 = vadd.f32 %v309_v38, %v1385_v22  ;;  %v543_v42 = vadd.f32 %v507_v32, %v506_v29 }
  0xee   :  { %v514_v43 = vmax.f32 %v308_v36, 0.0  ;;  %v513_v45 = vmax.f32 %v221_v37, 0.0  ;;  %v224_v46 = vpop.f32.mrb[6].mxu0  ;;  %532 = vadd.xlane.f32.xlu1 %v531_v39  ;;  %541 = vadd.xlane.f32.xlu0 %v540_v28 }
  0xef   :  { %v515_v47 = vmax.f32 %v310_v41, 0.0  ;;  %v225_v48 = vadd.f32 %v224_v46, %v1393_v44  ;;  %v313_v49 = vpop.f32.mrb[6].mxu1  ;;  %v226_v50 = vpop.f32.mrb[7].mxu0 }
  0xf0   :  { %v314_v51 = vadd.f32 %v313_v49, %v1393_v44  ;;  %v227_v52 = vadd.f32 %v226_v50, %v1393_v44  ;;  %v315_v53 = vpop.f32.mrb[7].mxu1  ;;  %v534_v54 = vadd.f32 %v513_v45, %v512_v40 }
  0xf1   :  { %v520_v55 = vmax.f32 %v225_v48, 0.0  ;;  %v316_v56 = vadd.f32 %v315_v53, %v1393_v44  ;;  %v546_v57 = vadd.f32 %v515_v47, %v514_v43 }
  0xf2   :  { %v522_v58 = vmax.f32 %v314_v51, 0.0  ;;  %v521_v59 = vmax.f32 %v227_v52, 0.0  ;;  %v384_v60 = vpop.f32.mrb[8].mxu0  ;;  %535 = vadd.xlane.f32.xlu1 %v534_v54  ;;  %544 = vadd.xlane.f32.xlu0 %v543_v42 }
  0xf3   :  { %v523_v61 = vmax.f32 %v316_v56, 0.0  ;;  %v385_v62 = vadd.f32 %v384_v60, %v1375_v2  ;;  %v473_v63 = vpop.f32.mrb[8].mxu1  ;;  %v386_v0 = vpop.f32.mrb[9].mxu0  ;;  %v20_v60 = vld [vmem:[%s1513_s1 + $0x40] sm:$0xff] }
  0xf4   :  { %v474_v1 = vadd.f32 %v473_v63, %v1375_v2  ;;  %v387_v3 = vadd.f32 %v386_v0, %v1375_v2  ;;  %v475_v4 = vpop.f32.mrb[9].mxu1  ;;  %v537_v5 = vadd.f32 %v521_v59, %v520_v55  ;;  %v27_v59 = vld [vmem:[%s1513_s1 + $0x78] sm:$0xff]  ;;  %1030 = vmatprep.mubr.msk.f32.mxu0 %vm623_vm2, %v20_v60  ;;  %v37_v63 = vld [vmem:[%s1513_s1 + $0xc8] sm:$0xff]  ;;  %v36_v0 = vld [vmem:[%s1513_s1 + $0xc0] sm:$0xff] }
  0xf5   :  { %v500_v6 = vmax.f32 %v385_v62, 0.0  ;;  %v476_v8 = vadd.f32 %v475_v4, %v1375_v2  ;;  %v549_v9 = vadd.f32 %v523_v61, %v522_v58  ;;  %v29_v58 = vld [vmem:[%s1513_s1 + $0x88] sm:$0xff]  ;;  %v31_v61 = vld [vmem:[%s1513_s1 + $0x98] sm:$0xff]  ;;  %v30_v62 = vld [vmem:[%s1513_s1 + $0x90] sm:$0xff] }
  0xf6   :  { %v502_v10 = vmax.f32 %v474_v1, 0.0  ;;  %v501_v11 = vmax.f32 %v387_v3, 0.0  ;;  %v390_v12 = vpop.f32.mrb[10].mxu0  ;;  %547 = vadd.xlane.f32.xlu1 %v546_v57  ;;  %538 = vadd.xlane.f32.xlu0 %v537_v5  ;;  %v26_v57 = vld [vmem:[%s1513_s1 + $0x70] sm:$0xff]  ;;  %v39_v1 = vld [vmem:[%s1513_s1 + $0xd8] sm:$0xff] }
  0xf7   :  { %v503_v13 = vmax.f32 %v476_v8, 0.0  ;;  %v391_v15 = vadd.f32 %v390_v12, %v1381_v14  ;;  %v479_v16 = vpop.f32.mrb[10].mxu1  ;;  %v392_v17 = vpop.f32.mrb[11].mxu0  ;;  %v38_v3 = vld [vmem:[%s1513_s1 + $0xd0] sm:$0xff]  ;;  %v41_v4 = vld [vmem:[%s1513_s1 + $0xe8] sm:$0x1] }
  0xf8   :  { %v480_v18 = vadd.f32 %v479_v16, %v1381_v14  ;;  %v393_v19 = vadd.f32 %v392_v17, %v1381_v14  ;;  %v481_v20 = vpop.f32.mrb[11].mxu1  ;;  %v552_v21 = vadd.f32 %v501_v11, %v500_v6 }
  0xf9   :  { %v508_v23 = vmax.f32 %v391_v15, 0.0  ;;  %v482_v2 = vadd.f32 %v481_v20, %v1381_v14  ;;  %v564_v24 = vadd.f32 %v503_v13, %v502_v10 }
  0xfa   :  { %v510_v25 = vmax.f32 %v480_v18, 0.0  ;;  %v509_v26 = vmax.f32 %v393_v19, 0.0  ;;  %v396_v27 = vpop.f32.mrb[12].mxu0  ;;  %553 = vadd.xlane.f32.xlu1 %v552_v21  ;;  %550 = vadd.xlane.f32.xlu0 %v549_v9 }
  0xfb   :  { %v511_v28 = vmax.f32 %v482_v2, 0.0  ;;  %v397_v29 = vadd.f32 %v396_v27, %v1385_v22  ;;  %v485_v30 = vpop.f32.mrb[12].mxu1  ;;  %v398_v31 = vpop.f32.mrb[13].mxu0 }
  0xfc   :  { %v486_v32 = vadd.f32 %v485_v30, %v1385_v22  ;;  %v399_v33 = vadd.f32 %v398_v31, %v1385_v22  ;;  %v487_v34 = vpop.f32.mrb[13].mxu1  ;;  %v555_v35 = vadd.f32 %v509_v26, %v508_v23 }
  0xfd   :  { %v516_v36 = vmax.f32 %v397_v29, 0.0  ;;  %v488_v14 = vadd.f32 %v487_v34, %v1385_v22  ;;  %v567_v37 = vadd.f32 %v511_v28, %v510_v25 }
  0xfe   :  { %v518_v38 = vmax.f32 %v486_v32, 0.0  ;;  %v517_v39 = vmax.f32 %v399_v33, 0.0  ;;  %v402_v40 = vpop.f32.mrb[14].mxu0  ;;  %565 = vadd.xlane.f32.xlu1 %v564_v24  ;;  %556 = vadd.xlane.f32.xlu0 %v555_v35 }
  0xff   :  { %v519_v41 = vmax.f32 %v488_v14, 0.0  ;;  %v403_v42 = vadd.f32 %v402_v40, %v1393_v44  ;;  %v491_v43 = vpop.f32.mrb[14].mxu1  ;;  %v404_v45 = vpop.f32.mrb[15].mxu0 }
 0x100   :  { %v492_v46 = vadd.f32 %v491_v43, %v1393_v44  ;;  %v405_v47 = vadd.f32 %v404_v45, %v1393_v44  ;;  %v493_v48 = vpop.f32.mrb[15].mxu1  ;;  %v558_v49 = vadd.f32 %v517_v39, %v516_v36  ;;  %v22_v43 = vld [vmem:[%s1513_s1 + $0x50] sm:$0xff]  ;;  %v23_v45 = vld [vmem:[%s1513_s1 + $0x58] sm:$0xff] }
 0x101   :  { %v524_v50 = vmax.f32 %v403_v42, 0.0  ;;  %v494_v22 = vadd.f32 %v493_v48, %v1393_v44  ;;  %v570_v51 = vadd.f32 %v519_v41, %v518_v38  ;;  %v28_v44 = vld [vmem:[%s1513_s1 + $0x80] sm:$0xff]  ;;  %v21_v42 = vld [vmem:[%s1513_s1 + $0x48] sm:$0xff] }
 0x102   :  { %v526_v52 = vmax.f32 %v492_v46, 0.0  ;;  %v525_v53 = vmax.f32 %v405_v47, 0.0  ;;  %559 = vadd.xlane.f32.xlu1 %v558_v49  ;;  %568 = vadd.xlane.f32.xlu0 %v567_v37  ;;  %v24_v46 = vld [vmem:[%s1513_s1 + $0x60] sm:$0xff]  ;;  %v25_v47 = vld [vmem:[%s1513_s1 + $0x68] sm:$0xff] }
 0x103   :  { %v527_v54 = vmax.f32 %v494_v22, 0.0  ;;  %v32_v48 = vld [vmem:[%s1513_s1 + $0xa0] sm:$0xff] }
 0x104   :  { %v561_v55 = vadd.f32 %v525_v53, %v524_v50  ;;  %1051 = vmatprep.mubr.msk.f32.mxu1 %vm757_vm4, %v32_v48 }
 0x105   :  { %v573_v56 = vadd.f32 %v527_v54, %v526_v52 }
 0x106   :  { %571 = vadd.xlane.f32.xlu1 %v570_v51  ;;  %562 = vadd.xlane.f32.xlu0 %v561_v55 }
 0x10a   :  { %574 = vadd.xlane.f32.xlu0 %v573_v56 }
 0x117   :  { %595 = vperm.xlu1 %1140, %v26_v57  }
 0x11b   :  { %605 = vperm.xlu1 %1140, %v28_v44  }
 0x11f   :  { %610 = vperm.xlu1 %1140, %v29_v58  }
 0x120   :  { %600 = vperm.xlu0 %1139, %v27_v59  }
 0x123   :  { %620 = vperm.xlu1 %1140, %v31_v61  }
 0x124   :  { %615 = vperm.xlu0 %1139, %v30_v62  }
 0x127   :  { %744 = vperm.xlu1 %1140, %v37_v63  }
 0x128   :  { %739 = vperm.xlu0 %1139, %v36_v0  }
 0x12b   :  { %754 = vperm.xlu1 %1140, %v39_v1  }
 0x12c   :  { %749 = vperm.xlu0 %1139, %v38_v3  }
 0x130   :  { %857 = vperm.xlu0 %1139, %v41_v4  }
 0x177   :  { %v530_v5 = vpop.xlane.xlu0 %529 }
 0x17b   :  { %v533_v6 = vpop.xlane.xlu1 %532  ;;  %v542_v8 = vpop.xlane.xlu0 %541 }
 0x17c   :  { %v577_v9 = vsel %vm576_vm3, %v530_v5, %v542_v8  ;;  %v33_v5 = vld [vmem:[%s1513_s1 + $0xa8] sm:$0xff]  ;;  %v35_v8 = vld [vmem:[%s1513_s1 + $0xb8] sm:$0xff] }
 0x17d   :  { %v581_v13 = vmul.f32 0.00390625, %v577_v9  ;;  %v1167_v9 = vmov 0.0|0.0  }
 0x17f   :  { %v536_v10 = vpop.xlane.xlu1 %535  ;;  %v545_v11 = vpop.xlane.xlu0 %544 }
 0x180   :  { %v578_v12 = vsel %vm576_vm3, %v533_v6, %v545_v11  ;;  %v34_v6 = vld [vmem:[%s1513_s1 + $0xb0] sm:$0xff] }
 0x181   :  { %v582_v15 = vmul.f32 0.00390625, %v578_v12 }
 0x183   :  { %v548_v16 = vpop.xlane.xlu1 %547  ;;  %v539_v17 = vpop.xlane.xlu0 %538  ;;  %v1100_v18 = vpack.c.bf16 %v582_v15, %v581_v13 }
 0x184   :  { %v579_v19 = vsel %vm576_vm3, %v536_v10, %v548_v16 }
 0x185   :  { %1101 = vmatprep.subr.bf16.mxu0 %v1100_v18  ;;  %v583_v2 = vmul.f32 0.00390625, %v579_v19 }
 0x186   :  { %1103 = vmatpush3.bf16.msra.mxu0 %v1100_v18 }
 0x187   :  { %v554_v20 = vpop.xlane.xlu1 %553  ;;  %v551_v21 = vpop.xlane.xlu0 %550 }
 0x188   :  { %v580_v23 = vsel %vm576_vm3, %v539_v17, %v551_v21 }
 0x189   :  { %v584_v24 = vmul.f32 0.00390625, %v580_v23 }
 0x18b   :  { %v566_v25 = vpop.xlane.xlu1 %565  ;;  %v557_v26 = vpop.xlane.xlu0 %556  ;;  %v1104_v27 = vpack.c.bf16 %v584_v24, %v583_v2 }
 0x18c   :  { %v585_v28 = vsel %vm576_vm3, %v554_v20, %v566_v25 }
 0x18d   :  { %1105 = vmatprep.subr.bf16.mxu0 %v1104_v27  ;;  %v589_v32 = vmul.f32 0.00390625, %v585_v28 }
 0x18e   :  { %1107 = vmatpush3.bf16.msra.mxu0 %v1104_v27 }
 0x18f   :  { %v560_v29 = vpop.xlane.xlu1 %559  ;;  %v569_v30 = vpop.xlane.xlu0 %568 }
 0x190   :  { %v586_v31 = vsel %vm576_vm3, %v557_v26, %v569_v30 }
 0x191   :  { %v590_v33 = vmul.f32 0.00390625, %v586_v31 }
 0x193   :  { %v572_v34 = vpop.xlane.xlu1 %571  ;;  %v563_v35 = vpop.xlane.xlu0 %562  ;;  %v1108_v36 = vpack.c.bf16 %v590_v33, %v589_v32 }
 0x194   :  { %v587_v14 = vsel %vm576_vm3, %v560_v29, %v572_v34 }
 0x195   :  { %1109 = vmatprep.subr.bf16.mxu0 %v1108_v36  ;;  %v591_v39 = vmul.f32 0.00390625, %v587_v14 }
 0x196   :  { %1111 = vmatpush3.bf16.msra.mxu0 %v1108_v36 }
 0x197   :  { %v575_v37 = vpop.xlane.xlu0 %574  ;;  %v596_v49 = vpop.permute.xlu1 %595 }
 0x198   :  { %v588_v38 = vsel %vm576_vm3, %v563_v35, %v575_v37 }
 0x199   :  { %v592_v40 = vmul.f32 0.00390625, %v588_v38 }
 0x19b   :  { %v1112_v41 = vpack.c.bf16 %v592_v40, %v591_v39  ;;  %v606_v50 = vpop.permute.xlu1 %605 }
 0x19d   :  { %1113 = vmatprep.subr.bf16.mxu0 %v1112_v41 }
 0x19e   :  { %1115 = vmatpush3.bf16.msra.mxu0 %v1112_v41 }
 0x19f   :  { %v601_v22 = vpop.permute.xlu0 %600  ;;  %v611_v54 = vpop.permute.xlu1 %610 }
 0x1a1   :  { %1031 = vmatmul.mubr.msk.f32.vlgmr.msra.gmra.mrb[16].mxu0 %vm623_vm2, %v21_v42 }
 0x1a2   :  { %1033 = vmatprep.mubr.msk.f32.mxu0 %vm623_vm2, %v22_v43 }
 0x1a3   :  { %v621_v60 = vpop.permute.xlu1 %620  ;;  %v616_v63 = vpop.permute.xlu0 %615 }
 0x1a5   :  { %1034 = vmatmul.mubr.msk.f32.gmra.mrb[18].mxu0 %vm623_vm2, %v23_v45 }
 0x1a6   :  { %1036 = vmatprep.mubr.msk.f32.mxu0 %vm623_vm2, %v24_v46 }
 0x1a7   :  { %v745_v10 = vpop.permute.xlu1 %744  ;;  %v740_v11 = vpop.permute.xlu0 %739 }
 0x1a9   :  { %1037 = vmatmul.mubr.msk.f32.gmra.mrb[20].mxu0 %vm623_vm2, %v25_v47 }
 0x1ab   :  { %v755_v17 = vpop.permute.xlu1 %754  ;;  %v750_v20 = vpop.permute.xlu0 %749 }
 0x1af   :  { %v858_v25 = vpop.permute.xlu0 %857 }
 0x274   :  { %v1032_v51 = vpop.f32.mrb[16].mxu0 }
 0x275   :  { %v714_v52 = vadd.f32 %v1032_v51, %v601_v22  ;;  %v708_v53 = vpop.f32.mrb[17].mxu0 }
 0x276   :  { %v709_v55 = vadd.f32 %v708_v53, %v596_v49 }
 0x278   :  { %v1116_v56 = vpack.c.bf16 %v714_v52, %v709_v55  ;;  %v1035_v57 = vpop.f32.mrb[18].mxu0 }
 0x279   :  { %v724_v44 = vadd.f32 %v1035_v57, %v611_v54  ;;  %v718_v58 = vpop.f32.mrb[19].mxu0 }
 0x27a   :  { %v719_v59 = vadd.f32 %v718_v58, %v606_v50  ;;  %1117 = vmatprep.subr.bf16.mxu1 %v1116_v56 }
 0x27b   :  { %1119 = vmatpush3.bf16.msra.mxu1 %v1116_v56 }
 0x27c   :  { %v1120_v61 = vpack.c.bf16 %v724_v44, %v719_v59  ;;  %v1038_v62 = vpop.f32.mrb[20].mxu0 }
 0x27d   :  { %v734_v0 = vadd.f32 %v1038_v62, %v621_v60  ;;  %v728_v1 = vpop.f32.mrb[21].mxu0 }
 0x27e   :  { %v729_v3 = vadd.f32 %v728_v1, %v616_v63  ;;  %1121 = vmatprep.subr.bf16.mxu1 %v1120_v61 }
 0x27f   :  { %1123 = vmatpush3.bf16.msra.mxu1 %v1120_v61 }
 0x280   :  { %v1124_v4 = vpack.c.bf16 %v734_v0, %v729_v3 }
 0x282   :  { %1125 = vmatprep.subr.bf16.mxu1 %v1124_v4 }
 0x283   :  { %1127 = vmatpush3.bf16.msra.mxu1 %v1124_v4 }
 0x284   :  { %1128 = vmatprep.subr.bf16.mxu1 %v1167_v9 }
 0x286   :  { %1052 = vmatmul.mubr.msk.f32.vlgmr.msra.gmra.mrb[16].mxu1 %vm757_vm4, %v33_v5 }
 0x287   :  { %1054 = vmatprep.mubr.msk.f32.mxu1 %vm757_vm4, %v34_v6 }
 0x28a   :  { %1055 = vmatmul.mubr.msk.f32.gmra.mrb[18].mxu1 %vm757_vm4, %v35_v8 }
 0x28b   :  { %1065 = vmatprep.mubr.msk.f32.mxu1 %vm1168_vm5, %v1165_v7  ;;  %v40_v7 = vld [vmem:[%s1513_s1 + $0xe0] sm:$0x1] }
 0x359   :  { %v1053_v12 = vpop.f32.mrb[16].mxu1 }
 0x35a   :  { %v842_v13 = vadd.f32 %v1053_v12, %v745_v10  ;;  %v836_v15 = vpop.f32.mrb[17].mxu1 }
 0x35b   :  { %v837_v16 = vadd.f32 %v836_v15, %v740_v11 }
 0x35d   :  { %v1129_v18 = vpack.c.bf16 %v842_v13, %v837_v16  ;;  %v1056_v19 = vpop.f32.mrb[18].mxu1 }
 0x35e   :  { %v852_v21 = vadd.f32 %v1056_v19, %v755_v17  ;;  %v846_v23 = vpop.f32.mrb[19].mxu1 }
 0x35f   :  { %v847_v2 = vadd.f32 %v846_v23, %v750_v20  ;;  %1130 = vmatpush3.bf16.msra.mxu1 %v1129_v18 }
 0x360   :  { %1131 = vmatprep.subr.bf16.mxu1 %v1167_v9 }
 0x361   :  { %v1132_v24 = vpack.c.bf16 %v852_v21, %v847_v2 }
 0x363   :  { %1133 = vmatpush3.bf16.msra.mxu1 %v1132_v24 }
 0x366   :  { %1066 = vmatmul.mubr.msk.f32.vlgmr.msra.gmra.mrb[20].mxu1 %vm860_vm6, %v40_v7 }
 0x439   :  { %v930_v26 = vpop.f32.mrb[20].mxu1 }
 0x43a   :  { %v931_v27 = vadd.f32 %v930_v26, %v858_v25  ;;  %v1067_v28 = vpop.f32.mrb[21].mxu1 }
 0x43c   :  { %935 = vst.msk [vmem:[#allocation2] sm:$0x1] %vm934_vm7, %v931_v27 }
 0x43d   :  { %1152 = shalt.err (!%p1149_p4)
}
 0x43e   :  { %s1153_s12 = scalar_lea.hbm %s1514_s2, 16 }
 0x43f   :  { %p1154_p5 = scmp.ne.s32.totalorder %s1514_s2, %s1153_s12  ;;  %p1157_p6 = scmp.lt.u32.totalorder %s1153_s12, %s1514_s2 }
 0x441   :  { %p1159_p7 = pnand %p1157_p6, %p1154_p5 }
 0x443   :  { %1162 = shalt.err (!%p1159_p7)
}
 0x444   :  { %945 = dma.vmem_to_hbm [thread:$0]  %s943_s8, 16, %s1514_s2, [#allocation3]  }
 0x445   :  { %1163 = dma.done.wait [#allocation3], 16  }
 0x446   :  { %1164 = vsyncadd [#allocation3], 4294967280 }
 0x447   :  { %949 = vsyncpa [#allocation3], 1 }

</bundles_post_ra>
